<compile_context>
chip_gen: v7x
topology: tpu7x:2x2x1
jax: 0.10.0
libtpu: 0.0.40
codegen_flags: <defaults>
</compile_context>

<pallas_src>
import jax
import jax.numpy as jnp
from jax.experimental import pallas as pl
from jax.experimental.pallas import tpu as pltpu

IN_FEATURES = 2
HIDDEN = 10
OUT_FEATURES = 1


def toy_mlp_kernel(w1_ref, b1_ref, w2_ref, b2_ref, x_ref, o_ref):
    # x_ref: [2, RB, C] f32 in VMEM (features on leading axis, batch on sublanes+lanes).
    # w1_ref: [20] f32 SMEM (row-major W1[j,k] -> w1_ref[2*j + k])
    # b1_ref: [10], w2_ref: [10], b2_ref: [1] f32 SMEM.
    # o_ref: [RB, C] f32 in VMEM.
    x0 = x_ref[0]                                   # [RB, C]
    x1 = x_ref[1]                                   # [RB, C]

    # Hoist the 41 SMEM scalar reads above the (statically unrolled) loop.
    w1 = [w1_ref[k] for k in range(IN_FEATURES * HIDDEN)]
    b1 = [b1_ref[j] for j in range(HIDDEN)]
    w2 = [w2_ref[j] for j in range(HIDDEN)]

    # Fold b2 into the accumulator init (saves one full elementwise pass).
    acc = jnp.full(x0.shape, b2_ref[0], dtype=jnp.float32)
    for j in range(HIDDEN):                         # statically unrolled: 10 hidden rows
        h_j = w1[2 * j] * x0 + w1[2 * j + 1] * x1 + b1[j]
        acc = acc + w2[j] * jnp.maximum(h_j, 0.0)   # ReLU + output FMA
    o_ref[...] = acc                                # sublane+lane-dense [RB, C] store


def toy_model_forward(x, W1, b1, W2, b2, *, rb=512, c=512):
    """x: [B, 2] f32 (torch convention); W1: [10, 2]; b1: [10]; W2: [1, 10]; b2: [1].

    Returns [B, 1] f32 == net2(relu(net1(x))).

    rb: sublane extent of a batch tile (multiple of 8).
    c : lane extent of a batch tile (multiple of 128).
    Per-tile VMEM = (2*rb*c + rb*c)*4 bytes; keep the double-buffered total under the
    scoped-VMEM default of the smallest target (16 MiB on v5e, 32 MiB on v6e/v7x).
    """
    assert rb % 8 == 0 and c % 128 == 0
    B = x.shape[0]
    tile = rb * c
    b_pad = pl.cdiv(B, tile) * tile

    # Layout plumbing in the wrapper: feature-major, batch split over (sublane, lane).
    xt = x.astype(jnp.float32).T                               # [2, B]
    if b_pad != B:
        xt = jnp.pad(xt, ((0, 0), (0, b_pad - B)))             # [2, B_pad]
    x3 = xt.reshape(IN_FEATURES, b_pad // c, c)                # [2, R, C] (contiguous)

    w1_flat = W1.reshape(-1).astype(jnp.float32)               # [20]
    b1_flat = b1.reshape(-1).astype(jnp.float32)               # [10]
    w2_flat = W2.reshape(-1).astype(jnp.float32)               # [10]
    b2_flat = b2.reshape(-1).astype(jnp.float32)               # [1]

    def smem_spec(n):
        return pl.BlockSpec((n,), lambda i: (0,),
                            memory_space=pltpu.MemorySpace.SMEM)

    grid = (b_pad // tile,)
    out2 = pl.pallas_call(
        toy_mlp_kernel,
        out_shape=jax.ShapeDtypeStruct((b_pad // c, c), jnp.float32),
        grid=grid,
        in_specs=[
            smem_spec(IN_FEATURES * HIDDEN),                          # w1 (flattened)
            smem_spec(HIDDEN),                                        # b1
            smem_spec(HIDDEN),                                        # w2 (flattened)
            smem_spec(OUT_FEATURES),                                  # b2
            pl.BlockSpec((IN_FEATURES, rb, c), lambda i: (0, i, 0)),  # x tile [2,rb,c]
        ],
        out_specs=pl.BlockSpec((rb, c), lambda i: (i, 0)),
        compiler_params=pltpu.CompilerParams(
            dimension_semantics=("parallel",)),                       # use both TCs on v7x
    )(w1_flat, b1_flat, w2_flat, b2_flat, x3)

    # Drop padded batch rows, back to torch [B, 1].
    return out2.reshape(b_pad)[:B].reshape(B, OUT_FEATURES)


if __name__ == "__main__":
    key = jax.random.PRNGKey(0)
    k1, k2, k3, k4, kx = jax.random.split(key, 5)

    # torch.nn.Linear-style init (uniform +/- 1/sqrt(fan_in)), torch weight layout.
    bound1 = 1.0 / jnp.sqrt(float(IN_FEATURES))
    bound2 = 1.0 / jnp.sqrt(float(HIDDEN))
    W1 = jax.random.uniform(k1, (HIDDEN, IN_FEATURES), jnp.float32, -bound1, bound1)
    b1 = jax.random.uniform(k2, (HIDDEN,), jnp.float32, -bound1, bound1)
    W2 = jax.random.uniform(k3, (OUT_FEATURES, HIDDEN), jnp.float32, -bound2, bound2)
    b2 = jax.random.uniform(k4, (OUT_FEATURES,), jnp.float32, -bound2, bound2)

    # Small demo shapes: B=2000 is not a tile multiple (exercises padding), and with
    # rb=8, c=128 the tile is 1024 batch elements -> b_pad=2048, grid=(2,): an even
    # number of tiles so both v7x TensorCores get equal work.
    B = 2000
    x = jax.random.normal(kx, (B, IN_FEATURES), jnp.float32)

    out = toy_model_forward(x, W1, b1, W2, b2, rb=8, c=128)
    out = jax.block_until_ready(out)

    # Pure-JAX reference (torch semantics: x @ W1.T + b1, etc.).
    ref = jnp.maximum(x @ W1.T + b1, 0.0) @ W2.T + b2
    assert out.shape == (B, OUT_FEATURES)
    assert jnp.allclose(out, ref, atol=1e-5, rtol=1e-5), float(jnp.max(jnp.abs(out - ref)))

    print("KERNEL_OK")
</pallas_src>

<mosaic_0001>
module attributes {stable_mosaic.version = 11 : i64} {
  func.func @toy_mlp_kernel(%arg0: i32, %arg1: memref<20xf32, #tpu.memory_space<smem>>, %arg2: memref<10xf32, #tpu.memory_space<smem>>, %arg3: memref<10xf32, #tpu.memory_space<smem>>, %arg4: memref<1xf32, #tpu.memory_space<smem>>, %arg5: memref<2x8x128xf32, #tpu.memory_space<vmem>>, %arg6: memref<8x128xf32, #tpu.memory_space<vmem>>) attributes {dimension_semantics = [#tpu.dimension_semantics<parallel>], iteration_bounds = array<i64: 2>, scalar_prefetch = 0 : i64, scratch_operands = 0 : i64, tpu.core_type = #tpu.core_type<tc>, window_params = [{transform_indices = @transform_0, window_bounds = array<i64: 20>}, {transform_indices = @transform_1, window_bounds = array<i64: 10>}, {transform_indices = @transform_2, window_bounds = array<i64: 10>}, {transform_indices = @transform_3, window_bounds = array<i64: 1>}, {transform_indices = @transform_4, window_bounds = array<i64: 2, 8, 128>}, {transform_indices = @transform_5, window_bounds = array<i64: 8, 128>}]} {
    %c0 = arith.constant 0 : index
    %c0_0 = arith.constant 0 : index
    %c0_1 = arith.constant 0 : index
    %0 = vector.load %arg5[%c0, %c0_0, %c0_1] : memref<2x8x128xf32, #tpu.memory_space<vmem>>, vector<1x8x128xf32>
    %1 = vector.shape_cast %0 : vector<1x8x128xf32> to vector<8x128xf32>
    %c1 = arith.constant 1 : index
    %c0_2 = arith.constant 0 : index
    %c0_3 = arith.constant 0 : index
    %2 = vector.load %arg5[%c1, %c0_2, %c0_3] : memref<2x8x128xf32, #tpu.memory_space<vmem>>, vector<1x8x128xf32>
    %3 = vector.shape_cast %2 : vector<1x8x128xf32> to vector<8x128xf32>
    %c0_4 = arith.constant 0 : index
    %4 = memref.load %arg1[%c0_4] : memref<20xf32, #tpu.memory_space<smem>>
    %c1_5 = arith.constant 1 : index
    %5 = memref.load %arg1[%c1_5] : memref<20xf32, #tpu.memory_space<smem>>
    %c2 = arith.constant 2 : index
    %6 = memref.load %arg1[%c2] : memref<20xf32, #tpu.memory_space<smem>>
    %c3 = arith.constant 3 : index
    %7 = memref.load %arg1[%c3] : memref<20xf32, #tpu.memory_space<smem>>
    %c4 = arith.constant 4 : index
    %8 = memref.load %arg1[%c4] : memref<20xf32, #tpu.memory_space<smem>>
    %c5 = arith.constant 5 : index
    %9 = memref.load %arg1[%c5] : memref<20xf32, #tpu.memory_space<smem>>
    %c6 = arith.constant 6 : index
    %10 = memref.load %arg1[%c6] : memref<20xf32, #tpu.memory_space<smem>>
    %c7 = arith.constant 7 : index
    %11 = memref.load %arg1[%c7] : memref<20xf32, #tpu.memory_space<smem>>
    %c8 = arith.constant 8 : index
    %12 = memref.load %arg1[%c8] : memref<20xf32, #tpu.memory_space<smem>>
    %c9 = arith.constant 9 : index
    %13 = memref.load %arg1[%c9] : memref<20xf32, #tpu.memory_space<smem>>
    %c10 = arith.constant 10 : index
    %14 = memref.load %arg1[%c10] : memref<20xf32, #tpu.memory_space<smem>>
    %c11 = arith.constant 11 : index
    %15 = memref.load %arg1[%c11] : memref<20xf32, #tpu.memory_space<smem>>
    %c12 = arith.constant 12 : index
    %16 = memref.load %arg1[%c12] : memref<20xf32, #tpu.memory_space<smem>>
    %c13 = arith.constant 13 : index
    %17 = memref.load %arg1[%c13] : memref<20xf32, #tpu.memory_space<smem>>
    %c14 = arith.constant 14 : index
    %18 = memref.load %arg1[%c14] : memref<20xf32, #tpu.memory_space<smem>>
    %c15 = arith.constant 15 : index
    %19 = memref.load %arg1[%c15] : memref<20xf32, #tpu.memory_space<smem>>
    %c16 = arith.constant 16 : index
    %20 = memref.load %arg1[%c16] : memref<20xf32, #tpu.memory_space<smem>>
    %c17 = arith.constant 17 : index
    %21 = memref.load %arg1[%c17] : memref<20xf32, #tpu.memory_space<smem>>
    %c18 = arith.constant 18 : index
    %22 = memref.load %arg1[%c18] : memref<20xf32, #tpu.memory_space<smem>>
    %c19 = arith.constant 19 : index
    %23 = memref.load %arg1[%c19] : memref<20xf32, #tpu.memory_space<smem>>
    %c0_6 = arith.constant 0 : index
    %24 = memref.load %arg2[%c0_6] : memref<10xf32, #tpu.memory_space<smem>>
    %c1_7 = arith.constant 1 : index
    %25 = memref.load %arg2[%c1_7] : memref<10xf32, #tpu.memory_space<smem>>
    %c2_8 = arith.constant 2 : index
    %26 = memref.load %arg2[%c2_8] : memref<10xf32, #tpu.memory_space<smem>>
    %c3_9 = arith.constant 3 : index
    %27 = memref.load %arg2[%c3_9] : memref<10xf32, #tpu.memory_space<smem>>
    %c4_10 = arith.constant 4 : index
    %28 = memref.load %arg2[%c4_10] : memref<10xf32, #tpu.memory_space<smem>>
    %c5_11 = arith.constant 5 : index
    %29 = memref.load %arg2[%c5_11] : memref<10xf32, #tpu.memory_space<smem>>
    %c6_12 = arith.constant 6 : index
    %30 = memref.load %arg2[%c6_12] : memref<10xf32, #tpu.memory_space<smem>>
    %c7_13 = arith.constant 7 : index
    %31 = memref.load %arg2[%c7_13] : memref<10xf32, #tpu.memory_space<smem>>
    %c8_14 = arith.constant 8 : index
    %32 = memref.load %arg2[%c8_14] : memref<10xf32, #tpu.memory_space<smem>>
    %c9_15 = arith.constant 9 : index
    %33 = memref.load %arg2[%c9_15] : memref<10xf32, #tpu.memory_space<smem>>
    %c0_16 = arith.constant 0 : index
    %34 = memref.load %arg3[%c0_16] : memref<10xf32, #tpu.memory_space<smem>>
    %c1_17 = arith.constant 1 : index
    %35 = memref.load %arg3[%c1_17] : memref<10xf32, #tpu.memory_space<smem>>
    %c2_18 = arith.constant 2 : index
    %36 = memref.load %arg3[%c2_18] : memref<10xf32, #tpu.memory_space<smem>>
    %c3_19 = arith.constant 3 : index
    %37 = memref.load %arg3[%c3_19] : memref<10xf32, #tpu.memory_space<smem>>
    %c4_20 = arith.constant 4 : index
    %38 = memref.load %arg3[%c4_20] : memref<10xf32, #tpu.memory_space<smem>>
    %c5_21 = arith.constant 5 : index
    %39 = memref.load %arg3[%c5_21] : memref<10xf32, #tpu.memory_space<smem>>
    %c6_22 = arith.constant 6 : index
    %40 = memref.load %arg3[%c6_22] : memref<10xf32, #tpu.memory_space<smem>>
    %c7_23 = arith.constant 7 : index
    %41 = memref.load %arg3[%c7_23] : memref<10xf32, #tpu.memory_space<smem>>
    %c8_24 = arith.constant 8 : index
    %42 = memref.load %arg3[%c8_24] : memref<10xf32, #tpu.memory_space<smem>>
    %c9_25 = arith.constant 9 : index
    %43 = memref.load %arg3[%c9_25] : memref<10xf32, #tpu.memory_space<smem>>
    %c0_26 = arith.constant 0 : index
    %44 = memref.load %arg4[%c0_26] : memref<1xf32, #tpu.memory_space<smem>>
    %45 = vector.broadcast %44 : f32 to vector<8x128xf32>
    %46 = vector.broadcast %4 : f32 to vector<8x128xf32>
    %47 = arith.mulf %46, %1 : vector<8x128xf32>
    %48 = vector.broadcast %5 : f32 to vector<8x128xf32>
    %49 = arith.mulf %48, %3 : vector<8x128xf32>
    %50 = arith.addf %47, %49 : vector<8x128xf32>
    %51 = vector.broadcast %24 : f32 to vector<8x128xf32>
    %52 = arith.addf %50, %51 : vector<8x128xf32>
    %cst = arith.constant 0.000000e+00 : f32
    %53 = vector.broadcast %cst : f32 to vector<8x128xf32>
    %54 = arith.maximumf %52, %53 : vector<8x128xf32>
    %55 = vector.broadcast %34 : f32 to vector<8x128xf32>
    %56 = arith.mulf %55, %54 : vector<8x128xf32>
    %57 = arith.addf %45, %56 : vector<8x128xf32>
    %58 = vector.broadcast %6 : f32 to vector<8x128xf32>
    %59 = arith.mulf %58, %1 : vector<8x128xf32>
    %60 = vector.broadcast %7 : f32 to vector<8x128xf32>
    %61 = arith.mulf %60, %3 : vector<8x128xf32>
    %62 = arith.addf %59, %61 : vector<8x128xf32>
    %63 = vector.broadcast %25 : f32 to vector<8x128xf32>
    %64 = arith.addf %62, %63 : vector<8x128xf32>
    %cst_27 = arith.constant 0.000000e+00 : f32
    %65 = vector.broadcast %cst_27 : f32 to vector<8x128xf32>
    %66 = arith.maximumf %64, %65 : vector<8x128xf32>
    %67 = vector.broadcast %35 : f32 to vector<8x128xf32>
    %68 = arith.mulf %67, %66 : vector<8x128xf32>
    %69 = arith.addf %57, %68 : vector<8x128xf32>
    %70 = vector.broadcast %8 : f32 to vector<8x128xf32>
    %71 = arith.mulf %70, %1 : vector<8x128xf32>
    %72 = vector.broadcast %9 : f32 to vector<8x128xf32>
    %73 = arith.mulf %72, %3 : vector<8x128xf32>
    %74 = arith.addf %71, %73 : vector<8x128xf32>
    %75 = vector.broadcast %26 : f32 to vector<8x128xf32>
    %76 = arith.addf %74, %75 : vector<8x128xf32>
    %cst_28 = arith.constant 0.000000e+00 : f32
    %77 = vector.broadcast %cst_28 : f32 to vector<8x128xf32>
    %78 = arith.maximumf %76, %77 : vector<8x128xf32>
    %79 = vector.broadcast %36 : f32 to vector<8x128xf32>
    %80 = arith.mulf %79, %78 : vector<8x128xf32>
    %81 = arith.addf %69, %80 : vector<8x128xf32>
    %82 = vector.broadcast %10 : f32 to vector<8x128xf32>
    %83 = arith.mulf %82, %1 : vector<8x128xf32>
    %84 = vector.broadcast %11 : f32 to vector<8x128xf32>
    %85 = arith.mulf %84, %3 : vector<8x128xf32>
    %86 = arith.addf %83, %85 : vector<8x128xf32>
    %87 = vector.broadcast %27 : f32 to vector<8x128xf32>
    %88 = arith.addf %86, %87 : vector<8x128xf32>
    %cst_29 = arith.constant 0.000000e+00 : f32
    %89 = vector.broadcast %cst_29 : f32 to vector<8x128xf32>
    %90 = arith.maximumf %88, %89 : vector<8x128xf32>
    %91 = vector.broadcast %37 : f32 to vector<8x128xf32>
    %92 = arith.mulf %91, %90 : vector<8x128xf32>
    %93 = arith.addf %81, %92 : vector<8x128xf32>
    %94 = vector.broadcast %12 : f32 to vector<8x128xf32>
    %95 = arith.mulf %94, %1 : vector<8x128xf32>
    %96 = vector.broadcast %13 : f32 to vector<8x128xf32>
    %97 = arith.mulf %96, %3 : vector<8x128xf32>
    %98 = arith.addf %95, %97 : vector<8x128xf32>
    %99 = vector.broadcast %28 : f32 to vector<8x128xf32>
    %100 = arith.addf %98, %99 : vector<8x128xf32>
    %cst_30 = arith.constant 0.000000e+00 : f32
    %101 = vector.broadcast %cst_30 : f32 to vector<8x128xf32>
    %102 = arith.maximumf %100, %101 : vector<8x128xf32>
    %103 = vector.broadcast %38 : f32 to vector<8x128xf32>
    %104 = arith.mulf %103, %102 : vector<8x128xf32>
    %105 = arith.addf %93, %104 : vector<8x128xf32>
    %106 = vector.broadcast %14 : f32 to vector<8x128xf32>
    %107 = arith.mulf %106, %1 : vector<8x128xf32>
    %108 = vector.broadcast %15 : f32 to vector<8x128xf32>
    %109 = arith.mulf %108, %3 : vector<8x128xf32>
    %110 = arith.addf %107, %109 : vector<8x128xf32>
    %111 = vector.broadcast %29 : f32 to vector<8x128xf32>
    %112 = arith.addf %110, %111 : vector<8x128xf32>
    %cst_31 = arith.constant 0.000000e+00 : f32
    %113 = vector.broadcast %cst_31 : f32 to vector<8x128xf32>
    %114 = arith.maximumf %112, %113 : vector<8x128xf32>
    %115 = vector.broadcast %39 : f32 to vector<8x128xf32>
    %116 = arith.mulf %115, %114 : vector<8x128xf32>
    %117 = arith.addf %105, %116 : vector<8x128xf32>
    %118 = vector.broadcast %16 : f32 to vector<8x128xf32>
    %119 = arith.mulf %118, %1 : vector<8x128xf32>
    %120 = vector.broadcast %17 : f32 to vector<8x128xf32>
    %121 = arith.mulf %120, %3 : vector<8x128xf32>
    %122 = arith.addf %119, %121 : vector<8x128xf32>
    %123 = vector.broadcast %30 : f32 to vector<8x128xf32>
    %124 = arith.addf %122, %123 : vector<8x128xf32>
    %cst_32 = arith.constant 0.000000e+00 : f32
    %125 = vector.broadcast %cst_32 : f32 to vector<8x128xf32>
    %126 = arith.maximumf %124, %125 : vector<8x128xf32>
    %127 = vector.broadcast %40 : f32 to vector<8x128xf32>
    %128 = arith.mulf %127, %126 : vector<8x128xf32>
    %129 = arith.addf %117, %128 : vector<8x128xf32>
    %130 = vector.broadcast %18 : f32 to vector<8x128xf32>
    %131 = arith.mulf %130, %1 : vector<8x128xf32>
    %132 = vector.broadcast %19 : f32 to vector<8x128xf32>
    %133 = arith.mulf %132, %3 : vector<8x128xf32>
    %134 = arith.addf %131, %133 : vector<8x128xf32>
    %135 = vector.broadcast %31 : f32 to vector<8x128xf32>
    %136 = arith.addf %134, %135 : vector<8x128xf32>
    %cst_33 = arith.constant 0.000000e+00 : f32
    %137 = vector.broadcast %cst_33 : f32 to vector<8x128xf32>
    %138 = arith.maximumf %136, %137 : vector<8x128xf32>
    %139 = vector.broadcast %41 : f32 to vector<8x128xf32>
    %140 = arith.mulf %139, %138 : vector<8x128xf32>
    %141 = arith.addf %129, %140 : vector<8x128xf32>
    %142 = vector.broadcast %20 : f32 to vector<8x128xf32>
    %143 = arith.mulf %142, %1 : vector<8x128xf32>
    %144 = vector.broadcast %21 : f32 to vector<8x128xf32>
    %145 = arith.mulf %144, %3 : vector<8x128xf32>
    %146 = arith.addf %143, %145 : vector<8x128xf32>
    %147 = vector.broadcast %32 : f32 to vector<8x128xf32>
    %148 = arith.addf %146, %147 : vector<8x128xf32>
    %cst_34 = arith.constant 0.000000e+00 : f32
    %149 = vector.broadcast %cst_34 : f32 to vector<8x128xf32>
    %150 = arith.maximumf %148, %149 : vector<8x128xf32>
    %151 = vector.broadcast %42 : f32 to vector<8x128xf32>
    %152 = arith.mulf %151, %150 : vector<8x128xf32>
    %153 = arith.addf %141, %152 : vector<8x128xf32>
    %154 = vector.broadcast %22 : f32 to vector<8x128xf32>
    %155 = arith.mulf %154, %1 : vector<8x128xf32>
    %156 = vector.broadcast %23 : f32 to vector<8x128xf32>
    %157 = arith.mulf %156, %3 : vector<8x128xf32>
    %158 = arith.addf %155, %157 : vector<8x128xf32>
    %159 = vector.broadcast %33 : f32 to vector<8x128xf32>
    %160 = arith.addf %158, %159 : vector<8x128xf32>
    %cst_35 = arith.constant 0.000000e+00 : f32
    %161 = vector.broadcast %cst_35 : f32 to vector<8x128xf32>
    %162 = arith.maximumf %160, %161 : vector<8x128xf32>
    %163 = vector.broadcast %43 : f32 to vector<8x128xf32>
    %164 = arith.mulf %163, %162 : vector<8x128xf32>
    %165 = arith.addf %153, %164 : vector<8x128xf32>
    %c0_36 = arith.constant 0 : index
    %c0_37 = arith.constant 0 : index
    %166 = vector.load %arg6[%c0_36, %c0_37] : memref<8x128xf32, #tpu.memory_space<vmem>>, vector<8x128xf32>
    tpu.vector_store %arg6[%c0_36, %c0_37], %165 {strides = array<i32>} : memref<8x128xf32, #tpu.memory_space<vmem>>, vector<8x128xf32>,
    return
  }
  func.func @transform_0(%arg0: i32) -> i32 {
    %c0_i32 = arith.constant 0 : i32
    %c0_i32_0 = arith.constant 0 : i32
    return %c0_i32 : i32
  }
  func.func @transform_1(%arg0: i32) -> i32 {
    %c0_i32 = arith.constant 0 : i32
    %c0_i32_0 = arith.constant 0 : i32
    return %c0_i32 : i32
  }
  func.func @transform_2(%arg0: i32) -> i32 {
    %c0_i32 = arith.constant 0 : i32
    %c0_i32_0 = arith.constant 0 : i32
    return %c0_i32 : i32
  }
  func.func @transform_3(%arg0: i32) -> i32 {
    %c0_i32 = arith.constant 0 : i32
    %c0_i32_0 = arith.constant 0 : i32
    return %c0_i32 : i32
  }
  func.func @transform_4(%arg0: i32) -> (i32, i32, i32) {
    %c0_i32 = arith.constant 0 : i32
    %c0_i32_0 = arith.constant 0 : i32
    %c0_i32_1 = arith.constant 0 : i32
    return %c0_i32, %arg0, %c0_i32_0 : i32, i32, i32
  }
  func.func @transform_5(%arg0: i32) -> (i32, i32) {
    %c0_i32 = arith.constant 0 : i32
    %c0_i32_0 = arith.constant 0 : i32
    return %arg0, %c0_i32 : i32, i32
  }
}

</mosaic_0001>

<bundles_post_ra>
// kernel: tpu_custom_call.1
= control target key start
LH: loop header
LB: loop body
LE: loop exit
PB: predicated region body
PF: predicated region fallthrough
CT: control target
= control target key end

     0   :  { %s1218_s0 = inlined_call_operand.vmem [shape: f32[20], index: 0, kind: input, shape index: {}]   ;;  %s1219_s1 = inlined_call_operand.vmem [shape: f32[10], index: 1, kind: input, shape index: {}]   ;;  %s1220_s2 = inlined_call_operand.vmem [shape: f32[10], index: 2, kind: input, shape index: {}]   ;;  %s1221_s3 = inlined_call_operand.<no memory space> [shape: f32[1], index: 3, kind: input, shape index: {}]   ;;  %s1222_s4 = inlined_call_operand.hbm [shape: f32[2,16,128], index: 4, kind: input, shape index: {}]   ;;  %s1223_s5 = inlined_call_operand.hbm [shape: f32[16,128], index: 5, kind: output, shape index: {}]  }
   0x1   :  { %1229 = sst [smem:[#allocation16_spill]] %s1218_s0 }
   0x2   :  { %1230 = sst [smem:[#allocation17_spill]] %s1219_s1 }
   0x3   :  { %10 = sst [smem:[#allocation2]] %s1221_s3 }
   0x4   :  { %11 = vsyncpa [#allocation6], 0 }
   0x5   :  { %12 = vsyncpa [#allocation8], 0 }
   0x6   :  { %13 = vsyncpa [#allocation4], 0 }
   0x7   :  { %15 = vsyncpa [#allocation4 + $0x1], 0 }
   0x8   :  { %16 = vsyncpa [#allocation5], 0 }
   0x9   :  { %18 = vsyncpa [#allocation5 + $0x1], 0  ;;  %s881_s20 = smov 0   ;;  %s883_s21 = smov 0  }
   0xa   :  { %s885_s22 = smov 0   ;;  %s887_s23 = smov 0  }
   0xb LB: > { %s902_s3 = sadd.s32 4294967295, %s838_s23   ;;  %s553_s24 = sadd.s32 4294967294, %s838_s23   ;;  %s838_s23 = sphi %s887_s23, %s1253_s23   ;;  %s834_s22 = sphi %s885_s22, %s1252_s22   ;;  %s830_s21 = sphi %s883_s21, %s1251_s21   ;;  %s826_s20 = sphi %s881_s20, %s1250_s20  }
   0xc   : > { %s906_s25 = sadd.s32 1, %s838_s23   ;;  %s115_s26 = sadd.s32 1, %s834_s22 }
   0xd   : > { %s112_s27 = ssub.s32 %s838_s23, %s906_s25  ;;  %p122_p0 = scmp.ne.s32.totalorder %s834_s22, %s830_s21 }
   0xe   : > { %p113_p1 = scmp.eq.s32.totalorder %s112_s27, 0  ;;  %p123_p2 = scmp.eq.s32.totalorder %s838_s23, 0 }
   0xf   : > { %p128_p3 = scmp.ne.s32.totalorder %s830_s21, %s826_s20  ;;  %p1224_p4 = scmp.eq.s32.totalorder %s902_s3, 0 }
  0x10   : > { %s918_s28 = scalar_select %p113_p1, %s834_s22, %s115_s26  }
  0x11   : > { %p920_p5 = por %p123_p2, %p122_p0  ;;  %p926_p6 = por %p1224_p4, %p128_p3 }
  0x12   : > { %p152_p7 = scmp.eq.s32.totalorder %s902_s3, 1  ;;  %p158_p8 = scmp.eq.s32.totalorder %s553_s24, 1 }
  0x13   : > { %s1232_s30 = scalar_select %p926_p6, 1, 0 }
  0x14   : > { %p554_p9 = scmp.ge.s32.totalorder %s838_s23, 1  ;;  %p165_p10 = scmp.lt.s32.totalorder %s838_s23, 3 }
  0x15   : > { %p933_p11 = por %p152_p7, %p122_p0  ;;  %p937_p12 = por %p158_p8, %p128_p3 }
  0x16   : > { %p941_p13 = pnand %p554_p9, %p165_p10  ;;  %s1236_s1 = sld [smem:[#allocation17_spill]] }
  0x17   : > { %s1233_s6 = scalar_select %p933_p11, 1, 0 }
  0x18   : > { %s1234_s7 = scalar_select %p937_p12, 1, 0 }
  0x19   : > { %s1235_s8 = scalar_select %p941_p13, 1, 0 }
  0x1a   : > { %p625_p1 = pneg %p941_p13  ;;  %p646_p2 = scmp.lt.s32.totalorder %s838_s23, 2 }
  0x1b   : > { %s1238_s0 = sld [smem:[#allocation16_spill]] }
  0x1c   : > { %s189_s11 = sshll.u32 %s1236_s1, 4  ;;  %p954_p7 = pnand %p625_p1, %p1224_p4  ;;  %s190_s11 = int_to_ptr.vmem [resolvable:$true] %s189_s11 }
  0x1d   : > { %p963_p3 = pnand %p646_p2, %p920_p5  ;;  %s689_s17 = scalar_lea.vmem %s190_s11, 16 }
  0x1e   : > { %p690_p8 = scmp.ne.s32.totalorder %s190_s11, %s689_s17  ;;  %p691_p9 = pneg %p954_p7 }
  0x1f   : > { %s1239_s16 = scalar_select %p963_p3, 1, 0 }
  0x20   : > { %p692_p10 = pnand %p691_p9, %p690_p8  ;;  %p697_p0 = scmp.lt.s32.totalorder %s190_s11, %s190_s11 }
  0x21   : > { %s178_s15 = sshll.u32 %s1238_s0, 4  ;;  %p698_p4 = scmp.lt.s32.totalorder %s689_s17, %s689_s17  ;;  %s179_s15 = int_to_ptr.vmem [resolvable:$true] %s178_s15 }
  0x22   : > { %p693_p1 = pneg %p692_p10 }
  0x23   : > { %p699_p12 = por %p698_p4, %p697_p0 }
  0x25   : > { %p700_p11 = pnand %p699_p12, %p693_p1 }
  0x27   : > { %703 = shalt.err (!%p700_p11)
}
  0x28   : > { %s840_s18 = smov [#allocation7]   ;;  %s200_s26 = sshll.u32 %s1220_s2, 4  ;;  %s201_s26 = int_to_ptr.vmem [resolvable:$true] %s200_s26 }
  0x29   : > { %631 = dma.vmem_to_smem (!%p954_p7), %s190_s11, 16, %s840_s18, [#allocation8]  }
  0x2a   : > { %s704_s27 = scalar_lea.vmem %s179_s15, 16  ;;  %p712_p10 = scmp.lt.s32.totalorder %s179_s15, %s179_s15 }
  0x2b   : > { %p705_p5 = scmp.ne.s32.totalorder %s179_s15, %s704_s27  ;;  %p713_p6 = scmp.lt.s32.totalorder %s704_s27, %s704_s27 }
  0x2d   : > { %p707_p2 = pnand %p705_p5, %p691_p9  ;;  %p714_p4 = por %p713_p6, %p712_p10 }
  0x2f   : > { %p708_p8 = pneg %p707_p2 }
  0x31   : > { %p715_p12 = pnand %p714_p4, %p708_p8 }
  0x33   : > { %718 = shalt.err (!%p715_p12)
}
  0x34   : > { %s841_s29 = smov [#allocation3]   ;;  %s719_s9 = scalar_lea.vmem %s201_s26, 16 }
  0x35   : > { %628 = dma.vmem_to_smem (!%p954_p7), %s179_s15, 16, %s841_s29, [#allocation6]  }
  0x36   : > { %p720_p11 = scmp.ne.s32.totalorder %s201_s26, %s719_s9  ;;  %p727_p13 = scmp.lt.s32.totalorder %s201_s26, %s201_s26 }
  0x37   : > { %p728_p5 = scmp.lt.s32.totalorder %s719_s9, %s719_s9 }
  0x38   : > { %p722_p0 = pnand %p720_p11, %p691_p9 }
  0x39   : > { %p729_p2 = por %p728_p5, %p727_p13 }
  0x3a   : > { %p723_p1 = pneg %p722_p0 }
  0x3c   : > { %p730_p3 = pnand %p729_p2, %p723_p1 }
  0x3e   : > { %733 = shalt.err (!%p730_p3)
}
  0x3f   : > { %s842_s10 = smov [#allocation9]   ;;  %s214_s11 = sand.u32 1, %s834_s22  }
  0x40   : > { %634 = dma.vmem_to_smem (!%p954_p7), %s201_s26, 16, %s842_s10, [#allocation8]  }
  0x41   : > { %s560_s13 = sshll.u32 %s838_s23, 7  ;;  %s559_s14 = sshll.u32 %s214_s11, 4 }
  0x42   : > { %s992_s18 = scalar_lea.hbm %s1222_s4, %s560_s13  ;;  %s218_s19 = scalar_lea.vmem [#allocation10], %s559_s14 }
  0x43   : > { %s224_s24 = sshll.u32 %s218_s19, 4  ;;  %s996_s12 = scalar_lea.sflag [#allocation4], %s214_s11  ;;  %s994_s24 = int_to_ptr.vmem [resolvable:$true] %s224_s24 }
  0x44   : > { %s734_s27 = scalar_lea.hbm %s992_s18, 256  ;;  %p1240_p13 = scmp.ne.s32.totalorder %s1239_s16, 0 }
  0x45   : > { %p735_p6 = scmp.ne.s32.totalorder %s992_s18, %s734_s27  ;;  %s739_s9 = scalar_lea.hbm %s1222_s4, 512 }
  0x46   : > { %p736_p7 = pneg %p1240_p13  ;;  %p740_p8 = scmp.lt.u32.totalorder %s992_s18, %s1222_s4 }
  0x47   : > { %p741_p10 = scmp.lt.u32.totalorder %s739_s9, %s734_s27  ;;  %p743_p12 = scmp.lt.u32.totalorder %s734_s27, %s992_s18 }
  0x48   : > { %p737_p3 = pnand %p736_p7, %p735_p6 }
  0x49   : > { %p742_p4 = por %p741_p10, %p740_p8 }
  0x4a   : > { %p738_p9 = pneg %p737_p3 }
  0x4b   : > { %p744_p11 = por %p743_p12, %p742_p4 }
  0x4d   : > { %p745_p0 = pnand %p744_p11, %p738_p9 }
  0x4f   : > { %748 = shalt.err (!%p745_p0)
}
  0x50   : > { %s749_s11 = scalar_lea.vmem %s994_s24, 256  ;;  %s843_s14 = smov [#allocation10]  }
  0x51   : > { %p750_p1 = scmp.ne.s32.totalorder %s994_s24, %s749_s11  ;;  %s754_s15 = sshll.u32 %s843_s14, 4  ;;  %s755_s15 = int_to_ptr.vmem [resolvable:$false] %s754_s15 }
  0x52   : > { %s756_s17 = scalar_lea.vmem %s755_s15, 512  ;;  %p757_p6 = scmp.lt.s32.totalorder %s994_s24, %s755_s15 }
  0x53   : > { %p752_p5 = pnand %p750_p1, %p736_p7  ;;  %p758_p3 = scmp.lt.s32.totalorder %s756_s17, %s749_s11 }
  0x55   : > { %p753_p2 = pneg %p752_p5  ;;  %p759_p8 = por %p758_p3, %p757_p6 }
  0x57   : > { %p760_p10 = pnand %p759_p8, %p753_p2 }
  0x59   : > { %763 = shalt.err (!%p760_p10)
}
  0x5a   : > { %s844_s19 = smov 256   ;;  %s845_s27 = smov 128  }
  0x5b   : > { %s846_s26 = smov 8   ;;  %p1241_p7 = scmp.ne.s32.totalorder %s1235_s8, 0 }
  0x5c   : > { %638 = dma.hbm_to_vmem [thread:$0]  (!%p1240_p13), %s992_s18, 256, %s994_s24, %s996_s12, %s844_s19, %s845_s27, %s846_s26  }
  0x5d   : > { %236 = sbr.rel (%p1241_p7) target bundleno = 169 (0xa9), region = 40  ;;  %p1242_p9 = scmp.eq.s32.totalorder (!%p1241_p7), %s902_s3, 0 }
  0x64   : > { %809 = dma.done.wait (%p1242_p9), [#allocation6], 16   ;;  %p1243_p4 = pmov %p1242_p9 }
  0x66   : > { %811 = vsyncadd (%p1243_p4), [#allocation6], 4294967280  ;;  %p1244_p12 = pmov %p1243_p4 }
  0x67   : > { %p1245_p11 = pmov %p1243_p4 }
  0x68   : > { %813 = dma.done.wait (%p1244_p12), [#allocation8], 32  }
  0x69   : > { %815 = vsyncadd (%p1245_p11), [#allocation8], 4294967264  ;;  %s1035_s29 = sand.u32 1, %s830_s21   ;;  %p1246_p13 = scmp.ne.s32.totalorder %s1232_s30, 0 }
  0x6a   : > { %s565_s8 = sshll.u32 %s1035_s29, 4  ;;  %s251_s16 = scalar_lea.sflag [#allocation4], %s1035_s29 }
  0x6b   : > { %s254_s18 = scalar_lea.vmem [#allocation10], %s565_s8 }
  0x6c   : > { %817 = dma.done.wait (%p1246_p13), %s251_s16, 256  }
  0x6d   : > { %819 = vsyncadd (%p1246_p13), %s251_s16, 4294967040 }
  0x6e   : > { %259 = sfence }
  0x6f   : > { %s285_s24 = sld [smem:[#allocation3]]  ;;  %s568_s12 = sld [smem:[#allocation3 + $0x1]]  ;;  %v1051_v0 = vld [vmem:[%s254_s18] sm:$0xff]  ;;  %v1057_v2 = vld [vmem:[%s254_s18 + $0x8] sm:$0xff] }
  0x70   : > { %s569_s9 = sld [smem:[#allocation3 + $0x2]]  ;;  %s570_s10 = sld [smem:[#allocation3 + $0x3]] }
  0x71   : > { %s571_s13 = sld [smem:[#allocation3 + $0x4]]  ;;  %s572_s11 = sld [smem:[#allocation3 + $0x5]] }
  0x72   : > { %s1043_s14 = sld [smem:[#allocation3 + $0x6]]  ;;  %s1045_s15 = sld [smem:[#allocation3 + $0x7]] }
  0x73   : > { %s1047_s17 = sld [smem:[#allocation3 + $0x8]]  ;;  %s1049_s19 = sld [smem:[#allocation3 + $0x9]] }
  0x74   : > { %s1053_s27 = sld [smem:[#allocation3 + $0xa]]  ;;  %s1055_s30 = sld [smem:[#allocation3 + $0xb]] }
  0x75   : > { %v327_v1 = vstv %s285_s24  ;;  %v329_v3 = vstv %s568_s12  ;;  %s1059_s26 = sld [smem:[#allocation3 + $0xc]]  ;;  %s1061_s8 = sld [smem:[#allocation3 + $0xd]] }
  0x76   : > { %v338_v4 = vstv %s569_s9  ;;  %v340_v5 = vstv %s570_s10  ;;  %s1063_s16 = sld [smem:[#allocation3 + $0xe]]  ;;  %v328_v6 = vmul.f32 %v327_v1, %v1051_v0  ;;  %s1066_s0 = sld [smem:[#allocation3 + $0xf]]  ;;  %v330_v9 = vmul.f32 %v1057_v2, %v329_v3 }
  0x77   : > { %v349_v7 = vstv %s571_s13  ;;  %v351_v8 = vstv %s572_s11  ;;  %v339_v10 = vmul.f32 %v338_v4, %v1051_v0  ;;  %v341_v11 = vmul.f32 %v1057_v2, %v340_v5  ;;  %s1072_s18 = sld [smem:[#allocation7]]  ;;  %s1074_s24 = sld [smem:[#allocation7 + $0x1]] }
  0x78   : > { %v360_v12 = vstv %s1043_s14  ;;  %v350_v13 = vmul.f32 %v349_v7, %v1051_v0  ;;  %v352_v14 = vmul.f32 %v1057_v2, %v351_v8  ;;  %v362_v15 = vstv %s1045_s15  ;;  %s1080_s12 = sld [smem:[#allocation7 + $0x2]]  ;;  %s1082_s9 = sld [smem:[#allocation7 + $0x3]] }
  0x79   : > { %v371_v16 = vstv %s1047_s17  ;;  %v361_v17 = vmul.f32 %v360_v12, %v1051_v0  ;;  %v363_v18 = vmul.f32 %v1057_v2, %v362_v15  ;;  %v373_v20 = vstv %s1049_s19  ;;  %s1088_s10 = sld [smem:[#allocation7 + $0x4]]  ;;  %s1090_s13 = sld [smem:[#allocation7 + $0x5]] }
  0x7a   : > { %v372_v19 = vmul.f32 %v371_v16, %v1051_v0  ;;  %v374_v21 = vmul.f32 %v1057_v2, %v373_v20  ;;  %v382_v22 = vstv %s1053_s27  ;;  %v384_v23 = vstv %s1055_s30  ;;  %s1097_s11 = sld [smem:[#allocation3 + $0x10]]  ;;  %s1099_s14 = sld [smem:[#allocation3 + $0x11]] }
  0x7b   : > { %v331_v24 = vadd.f32 %v330_v9, %v328_v6  ;;  %v342_v25 = vadd.f32 %v341_v11, %v339_v10  ;;  %v383_v26 = vmul.f32 %v382_v22, %v1051_v0  ;;  %v385_v27 = vmul.f32 %v1057_v2, %v384_v23  ;;  %s1101_s15 = sld [smem:[#allocation9]]  ;;  %s1103_s17 = sld [smem:[#allocation9 + $0x1]] }
  0x7c   : > { %v353_v28 = vadd.f32 %v352_v14, %v350_v13  ;;  %v364_v29 = vadd.f32 %v363_v18, %v361_v17  ;;  %v375_v30 = vadd.f32 %v374_v21, %v372_v19  ;;  %v393_v31 = vstv %s1059_s26  ;;  %s1107_s19 = sld [smem:[#allocation7 + $0x6]]  ;;  %s1109_s27 = sld [smem:[#allocation9 + $0x2]] }
  0x7d   : > { %v395_v32 = vstv %s1061_s8  ;;  %v332_v33 = vstv %s1072_s18  ;;  %v343_v34 = vstv %s1074_s24  ;;  %v386_v35 = vadd.f32 %v385_v27, %v383_v26  ;;  %s1114_s30 = sld [smem:[#allocation9 + $0x3]]  ;;  %s1118_s1 = sld [smem:[#allocation3 + $0x12]] }
  0x7e   : > { %v404_v36 = vstv %s1063_s16  ;;  %v333_v37 = vadd.f32 %v332_v33, %v331_v24  ;;  %v344_v38 = vadd.f32 %v343_v34, %v342_v25  ;;  %v354_v39 = vstv %s1080_s12  ;;  %s1120_s26 = sld [smem:[#allocation7 + $0x7]]  ;;  %s1125_s8 = sld [smem:[#allocation3 + $0x13]] }
  0x7f   : > { %v365_v40 = vstv %s1082_s9  ;;  %v355_v41 = vadd.f32 %v354_v39, %v353_v28  ;;  %v376_v42 = vstv %s1088_s10  ;;  %v387_v43 = vstv %s1090_s13  ;;  %s1127_s18 = sld [smem:[#allocation9 + $0x4]]  ;;  %s1131_s16 = sld [smem:[#allocation7 + $0x8]] }
  0x80   : > { %v406_v44 = vstv %s1066_s0  ;;  %v334_v45 = vmax.f32 %v333_v37, 0.0  ;;  %v394_v46 = vmul.f32 %v393_v31, %v1051_v0  ;;  %v396_v47 = vmul.f32 %v1057_v2, %v395_v32  ;;  %s1133_s24 = sld [smem:[#allocation2]]  ;;  %s1138_s0 = sld [smem:[#allocation7 + $0x9]] }
  0x81   : > { %v366_v48 = vadd.f32 %v365_v40, %v364_v29  ;;  %v377_v49 = vadd.f32 %v376_v42, %v375_v30  ;;  %v388_v50 = vadd.f32 %v387_v43, %v386_v35  ;;  %v335_v51 = vstv %s1101_s15  ;;  %s1140_s12 = sld [smem:[#allocation9 + $0x5]]  ;;  %s1146_s9 = sld [smem:[#allocation9 + $0x6]] }
  0x82   : > { %v345_v52 = vmax.f32 %v344_v38, 0.0  ;;  %v405_v53 = vmul.f32 %v404_v36, %v1051_v0  ;;  %v407_v54 = vmul.f32 %v1057_v2, %v406_v44  ;;  %v346_v55 = vstv %s1103_s17  ;;  %s1151_s10 = sld [smem:[#allocation9 + $0x7]]  ;;  %s1158_s13 = sld [smem:[#allocation9 + $0x8]] }
  0x83   : > { %v356_v56 = vmax.f32 %v355_v41, 0.0  ;;  %v415_v57 = vstv %s1097_s11  ;;  %v336_v58 = vmul.f32 %v335_v51, %v334_v45  ;;  %v357_v59 = vstv %s1109_s27  ;;  %s604_s11 = sld [smem:[#allocation9 + $0x9]]  ;;  %p1247_p1 = scmp.ne.s32.totalorder %s1233_s6, 0 }
  0x84   : > { %v397_v60 = vadd.f32 %v396_v47, %v394_v46  ;;  %v417_v61 = vstv %s1099_s14  ;;  %v367_v62 = vmax.f32 %v366_v48, 0.0  ;;  %v378_v63 = vmax.f32 %v377_v49, 0.0  ;;  %s606_s14 = sshll.u32 %s902_s3, 7  ;;  %s847_s3 = smov [#allocation11]  }
  0x85   : > { %v389_v1 = vmax.f32 %v388_v50, 0.0  ;;  %v398_v3 = vstv %s1107_s19  ;;  %v347_v4 = vmul.f32 %v346_v55, %v345_v52  ;;  %v368_v5 = vstv %s1114_s30  ;;  %s1174_s30 = scalar_lea.hbm %s1223_s5, %s606_s14 }
  0x86   : > { %v408_v6 = vadd.f32 %v407_v54, %v405_v53  ;;  %v416_v7 = vmul.f32 %v415_v57, %v1051_v0  ;;  %v326_v8 = vstv %s1133_s24  ;;  %v358_v9 = vmul.f32 %v357_v59, %v356_v56 }
  0x87   : > { %v409_v10 = vstv %s1120_s26  ;;  %v418_v11 = vmul.f32 %v1057_v2, %v417_v61  ;;  %v337_v12 = vadd.f32 %v336_v58, %v326_v8  ;;  %v379_v13 = vstv %s1127_s18  ;;  %s439_s26 = scalar_lea.sflag [#allocation5], %s1035_s29  ;;  %s768_s18 = sshll.u32 %s847_s3, 4  ;;  %s769_s18 = int_to_ptr.vmem [resolvable:$false] %s768_s18 }
  0x88   : > { %v399_v14 = vadd.f32 %v398_v3, %v397_v60  ;;  %v426_v15 = vstv %s1118_s1  ;;  %v420_v17 = vstv %s1131_s16  ;;  %v428_v19 = vstv %s1125_s8  ;;  %s566_s1 = sshll.u32 %s1035_s29, 3  ;;  %s770_s16 = scalar_lea.vmem %s769_s18, 256 }
  0x89   : > { %v419_v16 = vadd.f32 %v418_v11, %v416_v7  ;;  %v427_v18 = vmul.f32 %v426_v15, %v1051_v0  ;;  %v348_v20 = vadd.f32 %v347_v4, %v337_v12  ;;  %v369_v21 = vmul.f32 %v368_v5, %v367_v62  ;;  %s281_s15 = scalar_lea.vmem [#allocation11], %s566_s1 }
  0x8a   : > { %v410_v22 = vadd.f32 %v409_v10, %v408_v6  ;;  %v429_v23 = vmul.f32 %v1057_v2, %v428_v19  ;;  %v380_v24 = vmul.f32 %v379_v13, %v378_v63  ;;  %v390_v25 = vstv %s1140_s12  ;;  %s452_s17 = sshll.u32 %s281_s15, 4  ;;  %s1176_s17 = int_to_ptr.vmem [resolvable:$true] %s452_s17 }
  0x8b   : > { %v431_v26 = vstv %s1138_s0  ;;  %v359_v27 = vadd.f32 %v358_v9, %v348_v20  ;;  %v400_v28 = vmax.f32 %v399_v14, 0.0  ;;  %v421_v29 = vadd.f32 %v420_v17, %v419_v16  ;;  %s764_s8 = scalar_lea.vmem %s1176_s17, 128  ;;  %p771_p6 = scmp.lt.s32.totalorder %s1176_s17, %s769_s18 }
  0x8c   : > { %v430_v30 = vadd.f32 %v429_v23, %v427_v18  ;;  %v401_v31 = vstv %s1146_s9  ;;  %v391_v0 = vmul.f32 %v390_v25, %v389_v1  ;;  %v411_v33 = vmax.f32 %v410_v22, 0.0  ;;  %p765_p0 = scmp.ne.s32.totalorder %s1176_s17, %s764_s8  ;;  %p772_p3 = scmp.lt.s32.totalorder %s770_s16, %s764_s8 }
  0x8d   : > { %v370_v32 = vadd.f32 %v369_v21, %v359_v27  ;;  %v412_v35 = vstv %s1151_s10  ;;  %v402_v37 = vmul.f32 %v401_v31, %v400_v28  ;;  %v422_v2 = vmax.f32 %v421_v29, 0.0 }
  0x8e   : > { %v432_v34 = vadd.f32 %v431_v26, %v430_v30  ;;  %v423_v38 = vstv %s1158_s13  ;;  %v413_v40 = vmul.f32 %v412_v35, %v411_v33  ;;  %v434_v42 = vstv %s604_s11  ;;  %p766_p5 = pnand %p765_p0, %p1247_p1  ;;  %p773_p8 = por %p772_p3, %p771_p6 }
  0x8f   : > { %v381_v36 = vadd.f32 %v380_v24, %v370_v32  ;;  %v424_v44 = vmul.f32 %v423_v38, %v422_v2 }
  0x90   : > { %v433_v41 = vmax.f32 %v432_v34, 0.0  ;;  %p767_p2 = pneg %p766_p5 }
  0x91   : > { %v392_v39 = vadd.f32 %v391_v0, %v381_v36 }
  0x92   : > { %v435_v46 = vmul.f32 %v434_v42, %v433_v41  ;;  %p774_p10 = pnand %p773_p8, %p767_p2 }
  0x93   : > { %v403_v43 = vadd.f32 %v402_v37, %v392_v39 }
  0x95   : > { %v414_v45 = vadd.f32 %v413_v40, %v403_v43 }
  0x97   : > { %v425_v47 = vadd.f32 %v424_v44, %v414_v45 }
  0x99   : > { %v436_v48 = vadd.f32 %v435_v46, %v425_v47 }
  0x9b   : > { %437 = vst [vmem:[%s281_s15] sm:$0xff] %v436_v48 }
  0x9c   : > { %777 = shalt.err (!%p774_p10)
}
  0x9d   : > { %s778_s29 = scalar_lea.hbm %s1174_s30, 128  ;;  %s782_s12 = scalar_lea.hbm %s1223_s5, 256 }
  0x9e   : > { %p779_p7 = scmp.ne.s32.totalorder %s1174_s30, %s778_s29  ;;  %p783_p12 = scmp.lt.u32.totalorder %s1174_s30, %s1223_s5 }
  0x9f   : > { %p784_p11 = scmp.lt.u32.totalorder %s782_s12, %s778_s29  ;;  %p786_p0 = scmp.lt.u32.totalorder %s778_s29, %s1174_s30 }
  0xa0   : > { %p780_p9 = pnand %p779_p7, %p1247_p1 }
  0xa1   : > { %p785_p13 = por %p784_p11, %p783_p12 }
  0xa2   : > { %p781_p4 = pneg %p780_p9 }
  0xa3   : > { %p787_p5 = por %p786_p0, %p785_p13 }
  0xa5   : > { %p788_p2 = pnand %p787_p5, %p781_p4 }
  0xa7   : > { %791 = shalt.err (!%p788_p2)
}
  0xa8   : > { %623 = dma.vmem_to_hbm [thread:$0]  (%p1247_p1), %s1176_s17, 128, %s1174_s30, %s439_s26  }
  0xa9 PF: > { %s464_s13 = sand.u32 1, %s826_s20   ;;  %p1248_p6 = scmp.ne.s32.totalorder %s1234_s7, 0 }
  0xaa   : > { %p1249_p3 = scmp.ge.s32.totalorder %s838_s23, 2  ;;  %s465_s11 = scalar_lea.sflag [#allocation5], %s464_s13 }
  0xac   : > { %p640_p8 = pnand %p1249_p3, %p1248_p6 }
  0xae   : > { %821 = dma.done.wait (!%p640_p8), %s465_s11, 128  }
  0xaf   : > { %823 = vsyncadd (!%p640_p8), %s465_s11, 4294967168  ;;  %p21_p10 = scmp.ge.s32.totalorder %s906_s25, 4   ;;  %s1250_s20 = smov %s830_s21 }
  0xb0   : > { %s1251_s21 = smov %s834_s22  ;;  %s1252_s22 = smov %s918_s28 }
  0xb1   : > { %s1253_s23 = smov %s906_s25  ;;  %23 = sbr.rel (!%p21_p10) target bundleno = 11 (0xb), region = 99 }
  0xb8   :  { %470 = vsyncpa [#allocation4], 1 }
  0xb9   :  { %472 = vsyncpa [#allocation4 + $0x1], 1 }
  0xba   :  { %473 = vsyncpa [#allocation5], 1 }
  0xbb   :  { %475 = vsyncpa [#allocation5 + $0x1], 1 }
  0xbc   :  { %476 = vsyncpa [#allocation6], 1 }
  0xbd   :  { %478 = vsyncpa [#allocation6 + $0x1], 1 }
  0xbe   :  { %479 = vsyncpa [#allocation8], 1 }

</bundles_post_ra>
